<compile_context>
chip_gen: v7x
topology: tpu7x:2x2x1
jax: 0.10.0
libtpu: 0.0.40
codegen_flags: <defaults>
</compile_context>

<pallas_src>
import jax
import jax.numpy as jnp
from jax.experimental import pallas as pl
from jax.experimental.pallas import tpu as pltpu


# ---------------------------------------------------------------------------
# Pallas kernel: BiLSTM + Projection DNN with range clipping
# ---------------------------------------------------------------------------
def _alignnet_decoder_kernel(
    x_ref,        # (T*B, D)   bf16  SSL features, time-major rows (t major, b minor)
    wih_f_ref,    # (D, 4H)    bf16  forward  LSTM input->gate weights (cols i,f,o,g)
    whh_f_ref,    # (H, 4H)    bf16  forward  LSTM hidden->gate weights (cols i,f,o,g)
    b_f_ref,      # (1, 4H)    f32   forward  LSTM bias (b_ih + b_hh), cols i,f,o,g
    wih_b_ref,    # (D, 4H)    bf16  backward LSTM
    whh_b_ref,    # (H, 4H)    bf16
    b_b_ref,      # (1, 4H)    f32
    w1f_ref,      # (H, DNN)   bf16  Projection Linear-1, forward-half rows
    w1b_ref,      # (H, DNN)   bf16  Projection Linear-1, backward-half rows
    b1_ref,       # (1, DNN)   f32
    w2_ref,       # (1, 1, DNN) f32  Projection Linear-2 (out dim 1) as a row
    b2_ref,       # (1, 1)     f32
    out_ref,      # (T, B)     f32   scores
    gx_f,         # scratch (T, B, 4H) f32  precomputed x@Wih + b (forward)
    gx_b,         # scratch (T, B, 4H) f32  precomputed x@Wih + b (backward)
    hseq_f,       # scratch (T, B, H) f32
    hseq_b,       # scratch (T, B, H) f32
):
    T, B, H4 = gx_f.shape
    H = H4 // 4
    DNN = w1f_ref.shape[-1]

    # ---- 1. hoisted input->gate projections (off the serial critical path) --
    # One wide (T*B, D) x (D, 4H) matmul per direction -> full-lane MXU tiles.
    x2 = x_ref[...]                                   # (T*B, D) bf16
    gx_f[...] = (
        jnp.dot(x2, wih_f_ref[...], preferred_element_type=jnp.float32)
        + b_f_ref[...]
    ).reshape(T, B, H4)
    gx_b[...] = (
        jnp.dot(x2, wih_b_ref[...], preferred_element_type=jnp.float32)
        + b_b_ref[...]
    ).reshape(T, B, H4)

    # ---- 2. interleaved forward/backward recurrence -------------------------
    # Loop-invariant recurrent weights: load once, keep resident.
    whh_f = whh_f_ref[...]
    whh_b = whh_b_ref[...]

    def cell(z, c):
        # z: (B, 4H) pre-activation, columns ordered [ i | f | o | g ].
        sig = jax.nn.sigmoid(z[:, : 3 * H])           # one EUP pass for i, f, o
        i = sig[:, :H]
        f = sig[:, H : 2 * H]
        o = sig[:, 2 * H :]
        g = jnp.tanh(z[:, 3 * H :])
        c_new = f * c + i * g
        h_new = o * jnp.tanh(c_new)
        return h_new, c_new

    zeros = jnp.zeros((B, H), jnp.float32)

    def body(t, carry):
        h_f, c_f, h_b, c_b = carry
        tb = T - 1 - t
        # Two independent recurrent chains per step -> VLIW/MXU overlap.
        # State stays f32; bf16 is used only as the MXU operand.
        z_f = gx_f[t] + jnp.dot(
            h_f.astype(jnp.bfloat16), whh_f, preferred_element_type=jnp.float32
        )
        z_b = gx_b[tb] + jnp.dot(
            h_b.astype(jnp.bfloat16), whh_b, preferred_element_type=jnp.float32
        )
        h_f, c_f = cell(z_f, c_f)
        h_b, c_b = cell(z_b, c_b)
        hseq_f[t] = h_f
        hseq_b[tb] = h_b
        return (h_f, c_f, h_b, c_b)

    jax.lax.fori_loop(0, T, body, (zeros, zeros, zeros, zeros))

    # ---- 3. Projection DNN (concat-free) ------------------------------------
    hf = hseq_f[...].reshape(T * B, H).astype(jnp.bfloat16)
    hb = hseq_b[...].reshape(T * B, H).astype(jnp.bfloat16)
    z1 = (
        jnp.dot(hf, w1f_ref[...], preferred_element_type=jnp.float32)
        + jnp.dot(hb, w1b_ref[...], preferred_element_type=jnp.float32)
        + b1_ref[...]
    )
    z1 = jnp.maximum(z1, 0.0)      # ReLU; nn.Dropout(0.3) is identity in eval mode
    # Second Linear has output dim 1 -> elementwise multiply + lane reduction
    # (avoids an N=1 MXU matmul and a trailing dim-1 masked-store output).
    z2 = jnp.sum(z1.reshape(T, B, DNN) * w2_ref[...], axis=-1) + b2_ref[...]
    out_ref[...] = jnp.tanh(z2) * 2.0 + 3.0          # range clipping -> [1, 5]


# ---------------------------------------------------------------------------
# Parameter repacking (PyTorch-style layout -> kernel layout)
# ---------------------------------------------------------------------------
def _prepare_decoder_params(params):
    H = params["whh_f"].shape[0]
    perm = jnp.array([0, 1, 3, 2], dtype=jnp.int32)   # i,f,g,o -> i,f,o,g

    def reorder(w):
        # (In, 4H) with column groups [i|f|g|o] -> [i|f|o|g]
        n_in = w.shape[0]
        w4 = w.reshape(n_in, 4, H)
        return jnp.take(w4, perm, axis=1).reshape(n_in, 4 * H)

    return {
        "wih_f": reorder(params["wih_f"]).astype(jnp.bfloat16),
        "whh_f": reorder(params["whh_f"]).astype(jnp.bfloat16),
        "b_f": reorder(params["b_f"]).astype(jnp.float32),
        "wih_b": reorder(params["wih_b"]).astype(jnp.bfloat16),
        "whh_b": reorder(params["whh_b"]).astype(jnp.bfloat16),
        "b_b": reorder(params["b_b"]).astype(jnp.float32),
        "w1_f": params["w1"][:H].astype(jnp.bfloat16),
        "w1_b": params["w1"][H:].astype(jnp.bfloat16),
        "b1": params["b1"].astype(jnp.float32),
        "w2": params["w2"].reshape(1, 1, -1).astype(jnp.float32),
        "b2": params["b2"].astype(jnp.float32),
    }


def _run_decoder(x_tbd, params):
    """x_tbd: (T, B, D) f32 time-major SSL features (B multiple of 8) -> (T, B) scores."""
    T, B, D = x_tbd.shape
    kp = _prepare_decoder_params(params)
    H = kp["whh_f"].shape[0]

    x2 = x_tbd.reshape(T * B, D).astype(jnp.bfloat16)

    vmem = pl.BlockSpec(memory_space=pltpu.MemorySpace.VMEM)
    args = (
        x2,
        kp["wih_f"], kp["whh_f"], kp["b_f"],
        kp["wih_b"], kp["whh_b"], kp["b_b"],
        kp["w1_f"], kp["w1_b"], kp["b1"], kp["w2"], kp["b2"],
    )
    return pl.pallas_call(
        _alignnet_decoder_kernel,
        out_shape=jax.ShapeDtypeStruct((T, B), jnp.float32),
        in_specs=[vmem] * len(args),
        out_specs=vmem,
        scratch_shapes=[
            pltpu.VMEM((T, B, 4 * H), jnp.float32),
            pltpu.VMEM((T, B, 4 * H), jnp.float32),
            pltpu.VMEM((T, B, H), jnp.float32),
            pltpu.VMEM((T, B, H), jnp.float32),
        ],
        compiler_params=pltpu.CompilerParams(
            vmem_limit_bytes=32 * 1024 * 1024,
        ),
    )(*args)


# ---------------------------------------------------------------------------
# Wrapper reproducing AlignNet.forward (default config: no listener/domain
# modeling, use_decoder_rnn=True, scalar output with range clipping).
# ---------------------------------------------------------------------------
HOP = 16  # stand-in SSL frontend frame hop


@jax.jit
def alignnet_forward(params, waveform, waveform_lengths):
    B, L = waveform.shape
    T = L // HOP

    # TODO(synk): real model uses s3prl wav2vec2 here; deterministic framing +
    # linear projection used as a stand-in SSL frontend.  Features are emitted
    # directly time-major so the big (T, B, D) activation is never transposed.
    frames = waveform[:, : T * HOP].reshape(B, T, HOP)
    frames_tm = jnp.transpose(frames, (1, 0, 2))              # (T, B, HOP)
    x_tbd = jnp.dot(frames_tm, params["ssl_proj"])            # (T, B, D)
    frame_lengths = waveform_lengths // HOP

    # Pad batch to the sublane granule (8): packs vregs / MXU rows in the
    # serial recurrence and makes in-kernel (T,B,*) <-> (T*B,*) reshapes free.
    pad_b = (-B) % 8
    if pad_b:
        x_tbd = jnp.pad(x_tbd, ((0, 0), (0, pad_b), (0, 0)))

    scores_tb = _run_decoder(x_tbd.astype(jnp.float32), params)   # (T, B+pad)
    # NOTE: like the reference (nn.LSTM on the padded batch, no packing),
    # padded frames also receive (in-range) scores; callers use frame_lengths.
    mean_scores = jnp.transpose(scores_tb)[:B, :, None]           # (B, T, 1)

    return {
        "waveform_lengths": waveform_lengths,
        "frame_lengths": frame_lengths,
        "mean_scores": mean_scores,
    }


def init_params(key, ssl_dim, rnn_dim, dnn_dim):
    ks = jax.random.split(key, 12)
    s = 0.1

    def rnd(k, shape):
        return (s * jax.random.normal(k, shape)).astype(jnp.float32)

    return {
        "ssl_proj": rnd(ks[0], (HOP, ssl_dim)),
        # forward LSTM (PyTorch gate order i, f, g, o along the 4H axis)
        "wih_f": rnd(ks[1], (ssl_dim, 4 * rnn_dim)),
        "whh_f": rnd(ks[2], (rnn_dim, 4 * rnn_dim)),
        "b_f": rnd(ks[3], (1, 4 * rnn_dim)),
        # backward LSTM
        "wih_b": rnd(ks[4], (ssl_dim, 4 * rnn_dim)),
        "whh_b": rnd(ks[5], (rnn_dim, 4 * rnn_dim)),
        "b_b": rnd(ks[6], (1, 4 * rnn_dim)),
        # Projection DNN
        "w1": rnd(ks[7], (2 * rnn_dim, dnn_dim)),
        "b1": rnd(ks[8], (1, dnn_dim)),
        "w2": rnd(ks[9], (dnn_dim, 1)),
        "b2": rnd(ks[10], (1, 1)),
    }


if __name__ == "__main__":
    # small shapes: batch=2, waveform length=128 (-> T=8 frames),
    # ssl_dim=32, rnn hidden=32, dnn hidden=64
    B, L = 2, 128
    SSL_DIM, RNN_DIM, DNN_DIM = 32, 32, 64

    key = jax.random.PRNGKey(0)
    k_wav, k_par = jax.random.split(key)
    waveform = jax.random.normal(k_wav, (B, L), dtype=jnp.float32)
    waveform_lengths = jnp.array([L, L - HOP], dtype=jnp.int32)

    params = init_params(k_par, SSL_DIM, RNN_DIM, DNN_DIM)

    out = alignnet_forward(params, waveform, waveform_lengths)
    out = jax.tree_util.tree_map(jax.block_until_ready, out)

    assert out["mean_scores"].shape == (B, L // HOP, 1)
    assert out["frame_lengths"].shape == (B,)
    # range_clipping => scores in [1, 5]
    assert bool(jnp.all(out["mean_scores"] >= 1.0)) and bool(
        jnp.all(out["mean_scores"] <= 5.0)
    )
    print("KERNEL_OK")
</pallas_src>

<mosaic_0001>
module attributes {stable_mosaic.version = 11 : i64} {
  func.func @_alignnet_decoder_kernel(%arg0: memref<64x32xbf16, #tpu.memory_space<vmem>>, %arg1: memref<32x128xbf16, #tpu.memory_space<vmem>>, %arg2: memref<32x128xbf16, #tpu.memory_space<vmem>>, %arg3: memref<1x128xf32, #tpu.memory_space<vmem>>, %arg4: memref<32x128xbf16, #tpu.memory_space<vmem>>, %arg5: memref<32x128xbf16, #tpu.memory_space<vmem>>, %arg6: memref<1x128xf32, #tpu.memory_space<vmem>>, %arg7: memref<32x64xbf16, #tpu.memory_space<vmem>>, %arg8: memref<32x64xbf16, #tpu.memory_space<vmem>>, %arg9: memref<1x64xf32, #tpu.memory_space<vmem>>, %arg10: memref<1x1x64xf32, #tpu.memory_space<vmem>>, %arg11: memref<1x1xf32, #tpu.memory_space<vmem>>, %arg12: memref<8x8xf32, #tpu.memory_space<vmem>>, %arg13: memref<8x8x128xf32, #tpu.memory_space<vmem>>, %arg14: memref<8x8x128xf32, #tpu.memory_space<vmem>>, %arg15: memref<8x8x32xf32, #tpu.memory_space<vmem>>, %arg16: memref<8x8x32xf32, #tpu.memory_space<vmem>>) attributes {dimension_semantics = [], scalar_prefetch = 0 : i64, scratch_operands = 4 : i64, tpu.core_type = #tpu.core_type<tc>} {
    %c0 = arith.constant 0 : index
    %c0_0 = arith.constant 0 : index
    %0 = vector.load %arg0[%c0, %c0_0] : memref<64x32xbf16, #tpu.memory_space<vmem>>, vector<64x32xbf16>
    %c0_1 = arith.constant 0 : index
    %c0_2 = arith.constant 0 : index
    %1 = vector.load %arg1[%c0_1, %c0_2] : memref<32x128xbf16, #tpu.memory_space<vmem>>, vector<32x128xbf16>
    %cst = arith.constant dense<0.000000e+00> : vector<64x128xf32>
    %2 = tpu.matmul %0, %1, %cst {dimension_numbers = #tpu.dot_dimension_numbers<[1], [0], [0], [1], [0, 0, 1, 1], [], []>} : vector<64x32xbf16>, vector<32x128xbf16>, vector<64x128xf32> -> vector<64x128xf32>
    %c0_3 = arith.constant 0 : index
    %c0_4 = arith.constant 0 : index
    %3 = vector.load %arg3[%c0_3, %c0_4] : memref<1x128xf32, #tpu.memory_space<vmem>>, vector<1x128xf32>
    %4 = vector.broadcast %3 : vector<1x128xf32> to vector<64x128xf32>
    %5 = arith.addf %2, %4 : vector<64x128xf32>
    %6 = vector.shape_cast %5 : vector<64x128xf32> to vector<8x8x128xf32>
    %c0_5 = arith.constant 0 : index
    %c0_6 = arith.constant 0 : index
    %c0_7 = arith.constant 0 : index
    %7 = vector.load %arg13[%c0_5, %c0_6, %c0_7] : memref<8x8x128xf32, #tpu.memory_space<vmem>>, vector<8x8x128xf32>
    tpu.vector_store %arg13[%c0_5, %c0_6, %c0_7], %6 {strides = array<i32>} : memref<8x8x128xf32, #tpu.memory_space<vmem>>, vector<8x8x128xf32>,
    %c0_8 = arith.constant 0 : index
    %c0_9 = arith.constant 0 : index
    %8 = vector.load %arg4[%c0_8, %c0_9] : memref<32x128xbf16, #tpu.memory_space<vmem>>, vector<32x128xbf16>
    %cst_10 = arith.constant dense<0.000000e+00> : vector<64x128xf32>
    %9 = tpu.matmul %0, %8, %cst_10 {dimension_numbers = #tpu.dot_dimension_numbers<[1], [0], [0], [1], [0, 0, 1, 1], [], []>} : vector<64x32xbf16>, vector<32x128xbf16>, vector<64x128xf32> -> vector<64x128xf32>
    %c0_11 = arith.constant 0 : index
    %c0_12 = arith.constant 0 : index
    %10 = vector.load %arg6[%c0_11, %c0_12] : memref<1x128xf32, #tpu.memory_space<vmem>>, vector<1x128xf32>
    %11 = vector.broadcast %10 : vector<1x128xf32> to vector<64x128xf32>
    %12 = arith.addf %9, %11 : vector<64x128xf32>
    %13 = vector.shape_cast %12 : vector<64x128xf32> to vector<8x8x128xf32>
    %c0_13 = arith.constant 0 : index
    %c0_14 = arith.constant 0 : index
    %c0_15 = arith.constant 0 : index
    %14 = vector.load %arg14[%c0_13, %c0_14, %c0_15] : memref<8x8x128xf32, #tpu.memory_space<vmem>>, vector<8x8x128xf32>
    tpu.vector_store %arg14[%c0_13, %c0_14, %c0_15], %13 {strides = array<i32>} : memref<8x8x128xf32, #tpu.memory_space<vmem>>, vector<8x8x128xf32>,
    %c0_16 = arith.constant 0 : index
    %c0_17 = arith.constant 0 : index
    %15 = vector.load %arg2[%c0_16, %c0_17] : memref<32x128xbf16, #tpu.memory_space<vmem>>, vector<32x128xbf16>
    %c0_18 = arith.constant 0 : index
    %c0_19 = arith.constant 0 : index
    %16 = vector.load %arg5[%c0_18, %c0_19] : memref<32x128xbf16, #tpu.memory_space<vmem>>, vector<32x128xbf16>
    %cst_20 = arith.constant 0.000000e+00 : f32
    %17 = vector.broadcast %cst_20 : f32 to vector<8x32xf32>
    %c0_i32 = arith.constant 0 : i32
    %c8_i32 = arith.constant 8 : i32
    %18 = arith.addi %c0_i32, %c8_i32 : i32
    %c1_i32 = arith.constant 1 : i32
    %19:4 = scf.for %arg17 = %c0_i32 to %18 step %c1_i32 iter_args(%arg18 = %17, %arg19 = %17, %arg20 = %17, %arg21 = %17) -> (vector<8x32xf32>, vector<8x32xf32>, vector<8x32xf32>, vector<8x32xf32>)  : i32 {
      %c7_i32 = arith.constant 7 : i32
      %50 = arith.subi %c7_i32, %arg17 : i32
      %51 = arith.index_cast %arg17 : i32 to index
      %c0_47 = arith.constant 0 : index
      %c0_48 = arith.constant 0 : index
      %52 = vector.load %arg13[%51, %c0_47, %c0_48] : memref<8x8x128xf32, #tpu.memory_space<vmem>>, vector<1x8x128xf32>
      %53 = vector.shape_cast %52 : vector<1x8x128xf32> to vector<8x128xf32>
      %54 = arith.truncf %arg18 : vector<8x32xf32> to vector<8x32xbf16>
      %cst_49 = arith.constant dense<0.000000e+00> : vector<8x128xf32>
      %55 = tpu.matmul %54, %15, %cst_49 {dimension_numbers = #tpu.dot_dimension_numbers<[1], [0], [0], [1], [0, 0, 1, 1], [], []>} : vector<8x32xbf16>, vector<32x128xbf16>, vector<8x128xf32> -> vector<8x128xf32>
      %56 = arith.addf %53, %55 : vector<8x128xf32>
      %57 = arith.index_cast %50 : i32 to index
      %c0_50 = arith.constant 0 : index
      %c0_51 = arith.constant 0 : index
      %58 = vector.load %arg14[%57, %c0_50, %c0_51] : memref<8x8x128xf32, #tpu.memory_space<vmem>>, vector<1x8x128xf32>
      %59 = vector.shape_cast %58 : vector<1x8x128xf32> to vector<8x128xf32>
      %60 = arith.truncf %arg20 : vector<8x32xf32> to vector<8x32xbf16>
      %cst_52 = arith.constant dense<0.000000e+00> : vector<8x128xf32>
      %61 = tpu.matmul %60, %16, %cst_52 {dimension_numbers = #tpu.dot_dimension_numbers<[1], [0], [0], [1], [0, 0, 1, 1], [], []>} : vector<8x32xbf16>, vector<32x128xbf16>, vector<8x128xf32> -> vector<8x128xf32>
      %62 = arith.addf %59, %61 : vector<8x128xf32>
      %63 = vector.extract_strided_slice %56 {offsets = [0, 0], sizes = [8, 96], strides = [1, 1]} : vector<8x128xf32> to vector<8x96xf32>
      %64 = arith.negf %63 : vector<8x96xf32>
      %65 = math.exp %64 : vector<8x96xf32>
      %cst_53 = arith.constant 1.000000e+00 : f32
      %66 = vector.broadcast %cst_53 : f32 to vector<8x96xf32>
      %67 = arith.addf %66, %65 : vector<8x96xf32>
      %68 = arith.divf %66, %67 : vector<8x96xf32>
      %69 = vector.extract_strided_slice %68 {offsets = [0, 0], sizes = [8, 32], strides = [1, 1]} : vector<8x96xf32> to vector<8x32xf32>
      %70 = vector.extract_strided_slice %68 {offsets = [0, 32], sizes = [8, 32], strides = [1, 1]} : vector<8x96xf32> to vector<8x32xf32>
      %71 = vector.extract_strided_slice %68 {offsets = [0, 64], sizes = [8, 32], strides = [1, 1]} : vector<8x96xf32> to vector<8x32xf32>
      %72 = vector.extract_strided_slice %56 {offsets = [0, 96], sizes = [8, 32], strides = [1, 1]} : vector<8x128xf32> to vector<8x32xf32>
      %73 = math.tanh %72 : vector<8x32xf32>
      %74 = arith.mulf %70, %arg19 : vector<8x32xf32>
      %75 = arith.mulf %69, %73 : vector<8x32xf32>
      %76 = arith.addf %74, %75 : vector<8x32xf32>
      %77 = math.tanh %76 : vector<8x32xf32>
      %78 = arith.mulf %71, %77 : vector<8x32xf32>
      %79 = vector.extract_strided_slice %62 {offsets = [0, 0], sizes = [8, 96], strides = [1, 1]} : vector<8x128xf32> to vector<8x96xf32>
      %80 = arith.negf %79 : vector<8x96xf32>
      %81 = math.exp %80 : vector<8x96xf32>
      %cst_54 = arith.constant 1.000000e+00 : f32
      %82 = vector.broadcast %cst_54 : f32 to vector<8x96xf32>
      %83 = arith.addf %82, %81 : vector<8x96xf32>
      %84 = arith.divf %82, %83 : vector<8x96xf32>
      %85 = vector.extract_strided_slice %84 {offsets = [0, 0], sizes = [8, 32], strides = [1, 1]} : vector<8x96xf32> to vector<8x32xf32>
      %86 = vector.extract_strided_slice %84 {offsets = [0, 32], sizes = [8, 32], strides = [1, 1]} : vector<8x96xf32> to vector<8x32xf32>
      %87 = vector.extract_strided_slice %84 {offsets = [0, 64], sizes = [8, 32], strides = [1, 1]} : vector<8x96xf32> to vector<8x32xf32>
      %88 = vector.extract_strided_slice %62 {offsets = [0, 96], sizes = [8, 32], strides = [1, 1]} : vector<8x128xf32> to vector<8x32xf32>
      %89 = math.tanh %88 : vector<8x32xf32>
      %90 = arith.mulf %86, %arg21 : vector<8x32xf32>
      %91 = arith.mulf %85, %89 : vector<8x32xf32>
      %92 = arith.addf %90, %91 : vector<8x32xf32>
      %93 = math.tanh %92 : vector<8x32xf32>
      %94 = arith.mulf %87, %93 : vector<8x32xf32>
      %95 = arith.index_cast %arg17 : i32 to index
      %c0_55 = arith.constant 0 : index
      %c0_56 = arith.constant 0 : index
      %96 = vector.load %arg15[%95, %c0_55, %c0_56] : memref<8x8x32xf32, #tpu.memory_space<vmem>>, vector<1x8x32xf32>
      %97 = vector.shape_cast %96 : vector<1x8x32xf32> to vector<8x32xf32>
      %98 = vector.shape_cast %78 : vector<8x32xf32> to vector<1x8x32xf32>
      tpu.vector_store %arg15[%95, %c0_55, %c0_56], %98 {strides = array<i32>} : memref<8x8x32xf32, #tpu.memory_space<vmem>>, vector<1x8x32xf32>,
      %99 = arith.index_cast %50 : i32 to index
      %c0_57 = arith.constant 0 : index
      %c0_58 = arith.constant 0 : index
      %100 = vector.load %arg16[%99, %c0_57, %c0_58] : memref<8x8x32xf32, #tpu.memory_space<vmem>>, vector<1x8x32xf32>
      %101 = vector.shape_cast %100 : vector<1x8x32xf32> to vector<8x32xf32>
      %102 = vector.shape_cast %94 : vector<8x32xf32> to vector<1x8x32xf32>
      tpu.vector_store %arg16[%99, %c0_57, %c0_58], %102 {strides = array<i32>} : memref<8x8x32xf32, #tpu.memory_space<vmem>>, vector<1x8x32xf32>,
      scf.yield %78, %76, %94, %92 : vector<8x32xf32>, vector<8x32xf32>, vector<8x32xf32>, vector<8x32xf32>
    }
    %c8_i32_21 = arith.constant 8 : i32
    %c0_22 = arith.constant 0 : index
    %c0_23 = arith.constant 0 : index
    %c0_24 = arith.constant 0 : index
    %20 = vector.load %arg15[%c0_22, %c0_23, %c0_24] : memref<8x8x32xf32, #tpu.memory_space<vmem>>, vector<8x8x32xf32>
    %21 = vector.shape_cast %20 : vector<8x8x32xf32> to vector<64x32xf32>
    %22 = arith.truncf %21 : vector<64x32xf32> to vector<64x32xbf16>
    %c0_25 = arith.constant 0 : index
    %c0_26 = arith.constant 0 : index
    %c0_27 = arith.constant 0 : index
    %23 = vector.load %arg16[%c0_25, %c0_26, %c0_27] : memref<8x8x32xf32, #tpu.memory_space<vmem>>, vector<8x8x32xf32>
    %24 = vector.shape_cast %23 : vector<8x8x32xf32> to vector<64x32xf32>
    %25 = arith.truncf %24 : vector<64x32xf32> to vector<64x32xbf16>
    %c0_28 = arith.constant 0 : index
    %c0_29 = arith.constant 0 : index
    %26 = vector.load %arg7[%c0_28, %c0_29] : memref<32x64xbf16, #tpu.memory_space<vmem>>, vector<32x64xbf16>
    %cst_30 = arith.constant dense<0.000000e+00> : vector<64x64xf32>
    %27 = tpu.matmul %22, %26, %cst_30 {dimension_numbers = #tpu.dot_dimension_numbers<[1], [0], [0], [1], [0, 0, 1, 1], [], []>} : vector<64x32xbf16>, vector<32x64xbf16>, vector<64x64xf32> -> vector<64x64xf32>
    %c0_31 = arith.constant 0 : index
    %c0_32 = arith.constant 0 : index
    %28 = vector.load %arg8[%c0_31, %c0_32] : memref<32x64xbf16, #tpu.memory_space<vmem>>, vector<32x64xbf16>
    %cst_33 = arith.constant dense<0.000000e+00> : vector<64x64xf32>
    %29 = tpu.matmul %25, %28, %cst_33 {dimension_numbers = #tpu.dot_dimension_numbers<[1], [0], [0], [1], [0, 0, 1, 1], [], []>} : vector<64x32xbf16>, vector<32x64xbf16>, vector<64x64xf32> -> vector<64x64xf32>
    %30 = arith.addf %27, %29 : vector<64x64xf32>
    %c0_34 = arith.constant 0 : index
    %c0_35 = arith.constant 0 : index
    %31 = vector.load %arg9[%c0_34, %c0_35] : memref<1x64xf32, #tpu.memory_space<vmem>>, vector<1x64xf32>
    %32 = vector.broadcast %31 : vector<1x64xf32> to vector<64x64xf32>
    %33 = arith.addf %30, %32 : vector<64x64xf32>
    %cst_36 = arith.constant 0.000000e+00 : f32
    %34 = vector.broadcast %cst_36 : f32 to vector<64x64xf32>
    %35 = arith.maximumf %33, %34 : vector<64x64xf32>
    %36 = vector.shape_cast %35 : vector<64x64xf32> to vector<8x8x64xf32>
    %c0_37 = arith.constant 0 : index
    %c0_38 = arith.constant 0 : index
    %c0_39 = arith.constant 0 : index
    %37 = vector.load %arg10[%c0_37, %c0_38, %c0_39] : memref<1x1x64xf32, #tpu.memory_space<vmem>>, vector<1x1x64xf32>
    %38 = vector.broadcast %37 : vector<1x1x64xf32> to vector<8x8x64xf32>
    %39 = arith.mulf %36, %38 : vector<8x8x64xf32>
    %cst_40 = arith.constant dense<0.000000e+00> : vector<8x8xf32>
    %40 = vector.multi_reduction <add>, %39, %cst_40 [2] : vector<8x8x64xf32> to vector<8x8xf32>
    %c0_41 = arith.constant 0 : index
    %c0_42 = arith.constant 0 : index
    %41 = vector.load %arg11[%c0_41, %c0_42] : memref<1x1xf32, #tpu.memory_space<vmem>>, vector<1x1xf32>
    %42 = vector.broadcast %41 : vector<1x1xf32> to vector<8x8xf32>
    %43 = arith.addf %40, %42 : vector<8x8xf32>
    %44 = math.tanh %43 : vector<8x8xf32>
    %cst_43 = arith.constant 2.000000e+00 : f32
    %45 = vector.broadcast %cst_43 : f32 to vector<8x8xf32>
    %46 = arith.mulf %44, %45 : vector<8x8xf32>
    %cst_44 = arith.constant 3.000000e+00 : f32
    %47 = vector.broadcast %cst_44 : f32 to vector<8x8xf32>
    %48 = arith.addf %46, %47 : vector<8x8xf32>
    %c0_45 = arith.constant 0 : index
    %c0_46 = arith.constant 0 : index
    %49 = vector.load %arg12[%c0_45, %c0_46] : memref<8x8xf32, #tpu.memory_space<vmem>>, vector<8x8xf32>
    tpu.vector_store %arg12[%c0_45, %c0_46], %48 {strides = array<i32>} : memref<8x8xf32, #tpu.memory_space<vmem>>, vector<8x8xf32>,
    return
  }
}

</mosaic_0001>

<bundles_post_ra>
// kernel: alignnet_forward.1
= control target key start
LH: loop header
LB: loop body
LE: loop exit
PB: predicated region body
PF: predicated region fallthrough
CT: control target
= control target key end

     0   :  { %vm95_vm0 = vcmask 261120   ;;  %v1311_v51 = vmov 0.0   ;;  %v1313_v52 = vmov 0.0   ;;  %v1315_v53 = vmov 0.0   ;;  %s1418_s1 = inlined_call_operand.vmem [shape: bf16[32,128], index: 1, kind: input, shape index: {}]   ;;  %s1419_s7 = inlined_call_operand.vmem [shape: bf16[32,64], index: 7, kind: input, shape index: {}]   ;;  %s1420_s8 = inlined_call_operand.vmem [shape: bf16[32,64], index: 8, kind: input, shape index: {}]   ;;  %s1421_s9 = inlined_call_operand.vmem [shape: f32[1,64], index: 9, kind: input, shape index: {}]   ;;  %s1422_s10 = inlined_call_operand.vmem [shape: f32[1,1,64], index: 10, kind: input, shape index: {}]   ;;  %s1423_s11 = inlined_call_operand.<no memory space> [shape: f32[1,1], index: 11, kind: input, shape index: {}]   ;;  %s1424_s12 = inlined_call_operand.vmem [shape: f32[8,8], index: 12, kind: output, shape index: {}]   ;;  %s1425_s4 = inlined_call_operand.vmem [shape: bf16[32,128], index: 4, kind: input, shape index: {}]   ;;  %s1426_s0 = inlined_call_operand.vmem [shape: bf16[64,32], index: 0, kind: input, shape index: {}]   ;;  %s1427_s2 = inlined_call_operand.vmem [shape: bf16[32,128], index: 2, kind: input, shape index: {}]   ;;  %s1428_s5 = inlined_call_operand.vmem [shape: bf16[32,128], index: 5, kind: input, shape index: {}]   ;;  %s1429_s3 = inlined_call_operand.vmem [shape: f32[1,128], index: 3, kind: input, shape index: {}]   ;;  %s1430_s6 = inlined_call_operand.vmem [shape: f32[1,128], index: 6, kind: input, shape index: {}]  }
   0x1   :  { %v17_v0 = vstv %s1423_s11  ;;  %v1075_v1 = vld [vmem:[%s1418_s1] sm:$0xff]   ;;  %v1077_v3 = vld [vmem:[%s1418_s1 + $0x8] sm:$0xff]   ;;  %v1081_v7 = vld [vmem:[%s1426_s0 + $0x10] sm:$0xff]   ;;  %v1317_v54 = vmov 0.0  }
   0x2   :  { %18 = vst [vmem:[#allocation6] sm:$0x1] %v17_v0  ;;  %v1076_v2 = vld [vmem:[%s1425_s4] sm:$0xff]   ;;  %958 = vmatprep.subr.bf16.mxu0 %v1075_v1  ;;  %v1078_v4 = vld [vmem:[%s1425_s4 + $0x8] sm:$0xff]   ;;  %v1082_v8 = vld [vmem:[%s1426_s0 + $0x18] sm:$0xff]  }
   0x3   :  { %970 = vmatprep.subr.bf16.mxu1 %v1076_v2  ;;  %959 = vmatpush3.bf16.msra.mxu0 %v1075_v1  ;;  %v1079_v5 = vld [vmem:[%s1426_s0] sm:$0xff]   ;;  %v1080_v6 = vld [vmem:[%s1426_s0 + $0x8] sm:$0xff]  }
   0x4   :  { %971 = vmatpush3.bf16.msra.mxu1 %v1076_v2  ;;  %960 = vmatprep.subr.bf16.mxu0 %v1077_v3  ;;  %v1268_v9 = vld [vmem:[%s1427_s2] sm:$0xf]  ;;  %v1273_v10 = vld [vmem:[%s1427_s2 + $0x4] sm:$0xf]  ;;  %v1278_v11 = vld [vmem:[%s1427_s2 + $0x8] sm:$0xf] }
   0x5   :  { %972 = vmatprep.subr.bf16.mxu1 %v1078_v4  ;;  %962 = vmatprep.mubr.msk.bf16.mxu0 %vm95_vm0, %v1079_v5  ;;  %v1283_v12 = vld [vmem:[%s1427_s2 + $0xc] sm:$0xf]  ;;  %v1288_v13 = vld [vmem:[%s1428_s5] sm:$0xf]  ;;  %v1293_v14 = vld [vmem:[%s1428_s5 + $0x4] sm:$0xf] }
   0x6   :  { %974 = vmatprep.mubr.msk.bf16.mxu1 %vm95_vm0, %v1079_v5  ;;  %v1298_v15 = vld [vmem:[%s1428_s5 + $0x8] sm:$0xf]  ;;  %v1303_v16 = vld [vmem:[%s1428_s5 + $0xc] sm:$0xf]  ;;  %v885_v17 = vld [vmem:[%s1429_s3] ss:$0 sm:$0xff] }
   0x7   :  { %961 = vmatpush3.bf16.msra.mxu0 %v1077_v3  ;;  %v896_v18 = vld [vmem:[%s1430_s6] ss:$0 sm:$0xff]  ;;  %s1319_s3 = smov 0  }
   0x8   :  { %973 = vmatpush3.bf16.msra.mxu1 %v1078_v4 }
   0xa   :  { %963 = vmatmul.mubr.msk.bf16.vlgmr.msra.gmra.mrb[0].mxu0 %vm95_vm0, %v1080_v6 }
   0xb   :  { %975 = vmatmul.mubr.msk.bf16.vlgmr.msra.gmra.mrb[0].mxu1 %vm95_vm0, %v1080_v6  ;;  %966 = vmatprep.mubr.msk.bf16.mxu0 %vm95_vm0, %v1081_v7 }
   0xc   :  { %978 = vmatprep.mubr.msk.bf16.mxu1 %vm95_vm0, %v1081_v7 }
  0x12   :  { %967 = vmatmul.mubr.msk.bf16.gmra.mrb[4].mxu0 %vm95_vm0, %v1082_v8 }
  0x13   :  { %979 = vmatmul.mubr.msk.bf16.gmra.mrb[4].mxu1 %vm95_vm0, %v1082_v8 }
  0xdd   :  { %v964_v19 = vpop.f32.mrb[0].mxu0 }
  0xde   :  { %v151_v20 = vadd.f32 %v964_v19, %v885_v17  ;;  %v976_v21 = vpop.f32.mrb[0].mxu1  ;;  %v142_v22 = vpop.f32.mrb[1].mxu0 }
  0xdf   :  { %v247_v23 = vadd.f32 %v976_v21, %v896_v18  ;;  %v143_v24 = vadd.f32 %v885_v17, %v142_v22  ;;  %v238_v25 = vpop.f32.mrb[1].mxu1  ;;  %v965_v26 = vpop.f32.mrb[2].mxu0 }
  0xe0   :  { %175 = vst [vmem:[#allocation2 + $0x10] sm:$0xff] %v151_v20  ;;  %v239_v27 = vadd.f32 %v896_v18, %v238_v25  ;;  %v154_v28 = vadd.f32 %v965_v26, %v885_v17  ;;  %v977_v29 = vpop.f32.mrb[2].mxu1  ;;  %v145_v30 = vpop.f32.mrb[3].mxu0 }
  0xe1   :  { %271 = vst [vmem:[#allocation3 + $0x10] sm:$0xff] %v247_v23  ;;  %173 = vst [vmem:[#allocation2] sm:$0xff] %v143_v24  ;;  %v250_v31 = vadd.f32 %v977_v29, %v896_v18  ;;  %v146_v32 = vadd.f32 %v885_v17, %v145_v30  ;;  %v241_v33 = vpop.f32.mrb[3].mxu1 }
  0xe2   :  { %269 = vst [vmem:[#allocation3] sm:$0xff] %v239_v27  ;;  %176 = vst [vmem:[#allocation2 + $0x18] sm:$0xff] %v154_v28  ;;  %v242_v34 = vadd.f32 %v896_v18, %v241_v33 }
  0xe3   :  { %272 = vst [vmem:[#allocation3 + $0x18] sm:$0xff] %v250_v31  ;;  %174 = vst [vmem:[#allocation2 + $0x8] sm:$0xff] %v146_v32 }
  0xe4   :  { %270 = vst [vmem:[#allocation3 + $0x8] sm:$0xff] %v242_v34 }
  0xe5   :  { %v968_v35 = vpop.f32.mrb[4].mxu0 }
  0xe6   :  { %v167_v36 = vadd.f32 %v968_v35, %v885_v17  ;;  %v980_v37 = vpop.f32.mrb[4].mxu1  ;;  %v158_v38 = vpop.f32.mrb[5].mxu0 }
  0xe7   :  { %v263_v39 = vadd.f32 %v980_v37, %v896_v18  ;;  %v159_v40 = vadd.f32 %v885_v17, %v158_v38  ;;  %v254_v41 = vpop.f32.mrb[5].mxu1  ;;  %v969_v42 = vpop.f32.mrb[6].mxu0 }
  0xe8   :  { %179 = vst [vmem:[#allocation2 + $0x30] sm:$0xff] %v167_v36  ;;  %v255_v43 = vadd.f32 %v896_v18, %v254_v41  ;;  %v170_v44 = vadd.f32 %v969_v42, %v885_v17  ;;  %v981_v45 = vpop.f32.mrb[6].mxu1  ;;  %v161_v46 = vpop.f32.mrb[7].mxu0 }
  0xe9   :  { %275 = vst [vmem:[#allocation3 + $0x30] sm:$0xff] %v263_v39  ;;  %177 = vst [vmem:[#allocation2 + $0x20] sm:$0xff] %v159_v40  ;;  %v266_v47 = vadd.f32 %v981_v45, %v896_v18  ;;  %v162_v48 = vadd.f32 %v885_v17, %v161_v46  ;;  %v257_v49 = vpop.f32.mrb[7].mxu1 }
  0xea   :  { %273 = vst [vmem:[#allocation3 + $0x20] sm:$0xff] %v255_v43  ;;  %180 = vst [vmem:[#allocation2 + $0x38] sm:$0xff] %v170_v44  ;;  %v258_v50 = vadd.f32 %v896_v18, %v257_v49 }
  0xeb   :  { %276 = vst [vmem:[#allocation3 + $0x38] sm:$0xff] %v266_v47  ;;  %178 = vst [vmem:[#allocation2 + $0x28] sm:$0xff] %v162_v48 }
  0xec   :  { %274 = vst [vmem:[#allocation3 + $0x28] sm:$0xff] %v258_v50 }
  0xed LB: > { %v904_v55 = vcombine.low %v1268_v9, %v1273_v10  ;;  %v1160_v56 = vmov 0.0   ;;  %v908_v57 = vcombine.low %v1288_v13, %v1293_v14  ;;  %v299_v58 = vpack.c.bf16 %v1154_v54, %v1154_v54  ;;  %s1161_s5 = smov 64   ;;  %s903_s6 = sshll.u32 %s1158_s3, 3  ;;  %s1158_s3 = sphi %s1319_s3, %s290_s3   ;;  %v1154_v54 = vphi %v1317_v54, %v445_v54   ;;  %v1150_v53 = vphi %v1315_v53, %v439_v53   ;;  %v1146_v52 = vphi %v1313_v52, %v469_v52   ;;  %v1142_v51 = vphi %v1311_v51, %v463_v51  }
  0xee   : > { %982 = vmatprep.subr.bf16.mxu0 %v1160_v56  ;;  %990 = vmatprep.subr.bf16.mxu1 %v1160_v56  ;;  %v905_v59 = vcombine.low %v1278_v11, %v1283_v12  ;;  %v909_v60 = vcombine.low %v1298_v15, %v1303_v16  ;;  %v362_v61 = vpack.c.bf16 %v1146_v52, %v1146_v52  ;;  %vm1162_vm1 = vmmov 0   ;;  %s295_s16 = ssub.s32 7, %s1158_s3  ;;  %s297_s17 = scalar_lea.vmem [#allocation2], %s903_s6 }
  0xef   : > { %983 = vmatpush3.bf16.msra.mxu0 %v904_v55  ;;  %991 = vmatpush3.bf16.msra.mxu1 %v908_v57  ;;  %s1346_s4 = sshll.u32 %s295_s16, 3  ;;  %s1163_s19 = smov 32  }
  0xf0   : > { %984 = vmatprep.subr.bf16.mxu0 %v1160_v56  ;;  %301 = vrot.lane.b32.xlu0 %v299_v58, %s1161_s5  ;;  %s360_s18 = scalar_lea.vmem [#allocation3], %s1346_s4  ;;  %s474_s20 = scalar_lea.vmem [#allocation4], %s903_s6 }
  0xf1   : > { %986 = vmatprep.mubr.msk.bf16.mxu0 %vm1162_vm1, %v1160_v56  ;;  %992 = vmatprep.subr.bf16.mxu1 %v1160_v56  ;;  %s480_s21 = scalar_lea.vmem [#allocation5], %s1346_s4  ;;  %s290_s3 = sadd.s32 1, %s1158_s3  }
  0xf2   : > { %994 = vmatprep.mubr.msk.bf16.mxu1 %vm1162_vm1, %v1160_v56  ;;  %v298_v0 = vld [vmem:[%s297_s17] sm:$0xff]  ;;  %p287_p0 = scmp.ge.s32.totalorder %s290_s3, 8  }
  0xf3   : > { %985 = vmatpush3.bf16.msra.mxu0 %v905_v59  ;;  %993 = vmatpush3.bf16.msra.mxu1 %v909_v60  ;;  %v361_v5 = vld [vmem:[%s360_s18] sm:$0xff]  ;;  %v1102_v46 = vld [vmem:[%s1420_s8 + $0x8] sm:$0xff] (%p287_p0)   ;;  %vm730_vm2 = vcmask (%p287_p0), 523264   ;;  %vm839_vm3 = vcmask (%p287_p0), 1041409   ;;  %vm841_vm4 = vcmask (%p287_p0), 1042434   ;;  %vm843_vm5 = vcmask (%p287_p0), 1043459  }
  0xf4   : > { %364 = vrot.lane.b32.xlu0 %v362_v61, %s1161_s5  ;;  %v1100_v44 = vld [vmem:[%s1420_s8] sm:$0xff] (%p287_p0)   ;;  %v1103_v47 = vld [vmem:[%s1419_s7 + $0x8] sm:$0xff] (%p287_p0)   ;;  %vm845_vm6 = vcmask (%p287_p0), 1044484   ;;  %vm847_vm7 = vcmask (%p287_p0), 1045509   ;;  %vm849_vm8 = vcmask (%p287_p0), 1046534   ;;  %vm851_vm9 = vcmask (%p287_p0), 1047559  }
  0xf5   :  { %v1101_v45 = vld [vmem:[%s1419_s7] sm:$0xff] (%p287_p0)   ;;  %998 = vmatprep.subr.bf16.mxu1 (%p287_p0), %v1100_v44  ;;  %vm854_vm10 = vcmask (%p287_p0), 64512  }
  0xf6   :  { %1010 = vmatprep.subr.bf16.mxu0 (%p287_p0), %v1101_v45 }
 0x162   : > { %v302_v62 = vpop.permute.xlu0 %301 }
 0x163   : > { %987 = vmatmul.mubr.msk.bf16.vlgmr.msra.gmra.mrb[0].mxu0 %vm95_vm0, %v302_v62 }
 0x164   :  { %1011 = vmatpush3.bf16.msra.mxu0 (%p287_p0), %v1101_v45 }
 0x165   :  { %1012 = vmatprep.subr.bf16.mxu0 (%p287_p0), %v1103_v47 }
 0x166   : > { %v365_v63 = vpop.permute.xlu0 %364 }
 0x167   : > { %995 = vmatmul.mubr.msk.bf16.vlgmr.msra.gmra.mrb[0].mxu1 %vm95_vm0, %v365_v63 }
 0x168   :  { %999 = vmatpush3.bf16.msra.mxu1 (%p287_p0), %v1100_v44  ;;  %1013 = vmatpush3.bf16.msra.mxu0 (%p287_p0), %v1103_v47 }
 0x169   :  { %1000 = vmatprep.subr.bf16.mxu1 (%p287_p0), %v1102_v46 }
 0x16c   :  { %1001 = vmatpush3.bf16.msra.mxu1 (%p287_p0), %v1102_v46 }
 0x236   : > { %v352_v1 = vpop.f32.mrb[0].mxu0 }
 0x237   : > { %v358_v2 = vadd.f32 %v352_v1, %v298_v0  ;;  %v988_v3 = vpop.f32.mrb[1].mxu0  ;;  %v1164_v0 = vmov (%p287_p0), 0  }
 0x238   : > { %v355_v4 = vpop.f32.mrb[2].mxu0  ;;  %1099 = vset.pattern.permute.xlu0 (%p287_p0), %v1164_v0  ;;  %v925_v3 = vld [vmem:[%s1421_s9] ss:$0 sm:$0xff] (%p287_p0) }
 0x239   : > { %1083 = vtanh.f32 %v358_v2  ;;  %v989_v6 = vpop.f32.mrb[3].mxu0  ;;  %v911_v22 = vmul.f32 -1.442695, %v358_v2 }
 0x23a   : > { %v415_v7 = vpop.f32.mrb[0].mxu1 }
 0x23b   : > { %v421_v8 = vadd.f32 %v415_v7, %v361_v5  ;;  %v996_v17 = vpop.f32.mrb[1].mxu1 }
 0x23c   : > { %v418_v18 = vpop.f32.mrb[2].mxu1 }
 0x23d   : > { %1085 = vtanh.f32 %v421_v8  ;;  %v997_v19 = vpop.f32.mrb[3].mxu1  ;;  %v912_v23 = vmul.f32 -1.442695, %v421_v8 }
 0x23e   : > { %1087 = vpow2.f32 %v911_v22 }
 0x23f   : > { %1089 = vpow2.f32 %v912_v23 }
 0x243   : > { %v1084_v20 = vpop.eup %1083 }
 0x244   : > { %431 = vrot.lane.b32.xlu1 %v1084_v20, %s1163_s19 }
 0x247   : > { %v1086_v21 = vpop.eup %1085 }
 0x248   : > { %455 = vrot.lane.b32.xlu1 %v1086_v21, %s1163_s19  ;;  %v1088_v24 = vpop.eup %1087 }
 0x249   : > { %v425_v25 = vadd.f32 1.0, %v1088_v24  ;;  %v1090_v26 = vpop.eup %1089  ;;  %v926_v24 = vld [vmem:[%s1422_s10] ss:$0 sm:$0xff] (%p287_p0) }
 0x24a   : > { %v449_v27 = vadd.f32 1.0, %v1090_v26 }
 0x24b   : > { %1091 = vrcp.f32 %v425_v25 }
 0x24c   : > { %1093 = vrcp.f32 %v449_v27 }
 0x255   : > { %v1092_v28 = vpop.eup %1091 }
 0x256   : > { %v1094_v31 = vpop.eup %1093  ;;  %v429_v34 = vmul.f32 %v1150_v53, %v1092_v28 }
 0x257   : > { %v453_v36 = vmul.f32 %v1142_v51, %v1094_v31 }
 0x2b6   : > { %v432_v29 = vpop.permute.xlu1 %431 }
 0x2b7   : > { %v434_v30 = vmul.f32 %v1092_v28, %v432_v29 }
 0x2b9   : > { %436 = vrot.lane.b32.xlu0 %v434_v30, %s1163_s19 }
 0x2ba   : > { %v456_v32 = vpop.permute.xlu1 %455 }
 0x2bb   : > { %v458_v33 = vmul.f32 %v1094_v31, %v456_v32 }
 0x2bd   : > { %460 = vrot.lane.b32.xlu1 %v458_v33, %s1163_s19 }
 0x32b   : > { %v437_v35 = vpop.permute.xlu0 %436 }
 0x32c   : > { %v439_v53 = vadd.f32 %v437_v35, %v429_v34  }
 0x32e   : > { %1095 = vtanh.f32 %v439_v53 }
 0x32f   : > { %v461_v37 = vpop.permute.xlu1 %460 }
 0x330   : > { %v463_v51 = vadd.f32 %v461_v37, %v453_v36  }
 0x332   : > { %1097 = vtanh.f32 %v463_v51 }
 0x338   : > { %v1096_v38 = vpop.eup %1095 }
 0x339   : > { %442 = vrot.lane.b32.xlu0 %v1096_v38, %s1163_s19 }
 0x33c   : > { %v1098_v39 = vpop.eup %1097 }
 0x33d   : > { %466 = vrot.lane.b32.xlu1 %v1098_v39, %s1163_s19 }
 0x3ab   : > { %v443_v40 = vpop.permute.xlu0 %442 }
 0x3ac   : > { %v445_v54 = vmul.f32 %v1092_v28, %v443_v40  }
 0x3ae   : > { %471 = vrot.lane.b32.xlu0 %v445_v54, %s1161_s5 }
 0x3af   : > { %v467_v41 = vpop.permute.xlu1 %466 }
 0x3b0   : > { %v469_v52 = vmul.f32 %v1094_v31, %v467_v41  }
 0x3b2   : > { %477 = vrot.lane.b32.xlu1 %v469_v52, %s1161_s5 }
 0x41f   :  { %289 = sbr.rel (!%p287_p0) target bundleno = 237 (0xed), region = 79 }
 0x420   : > { %v472_v42 = vpop.permute.xlu0 %471 }
 0x421   : > { %475 = vst.msk [vmem:[%s474_s20] sm:$0xff] %vm95_vm0, %v472_v42 }
 0x424   : > { %v478_v43 = vpop.permute.xlu1 %477 }
 0x425   : > { %481 = vst.msk [vmem:[%s480_s21] sm:$0xff] %vm95_vm0, %v478_v43 }
 0x428   :  { %v482_v11 = vld [vmem:[#allocation4] sm:$0xff]  ;;  %v483_v13 = vld [vmem:[#allocation4 + $0x8] sm:$0xff]  ;;  %v484_v49 = vld [vmem:[#allocation4 + $0x10] sm:$0xff] }
 0x429   :  { %v490_v16 = vpack.c.bf16 %v483_v13, %v482_v11  ;;  %v485_v50 = vld [vmem:[#allocation4 + $0x18] sm:$0xff]  ;;  %v486_v54 = vld [vmem:[#allocation4 + $0x20] sm:$0xff]  ;;  %v487_v55 = vld [vmem:[#allocation4 + $0x28] sm:$0xff] }
 0x42a   :  { %v491_v52 = vpack.c.bf16 %v485_v50, %v484_v49  ;;  %v492_v57 = vpack.c.bf16 %v487_v55, %v486_v54  ;;  %v488_v60 = vld [vmem:[#allocation4 + $0x30] sm:$0xff]  ;;  %v489_v61 = vld [vmem:[#allocation4 + $0x38] sm:$0xff] }
 0x42b   :  { %1014 = vmatprep.mubr.msk.bf16.mxu0 %vm95_vm0, %v490_v16  ;;  %v493_v63 = vpack.c.bf16 %v489_v61, %v488_v60 }
 0x42c   :  { %v494_v9 = vld [vmem:[#allocation5] sm:$0xff]  ;;  %v495_v10 = vld [vmem:[#allocation5 + $0x8] sm:$0xff]  ;;  %v496_v14 = vld [vmem:[#allocation5 + $0x10] sm:$0xff]  ;;  %1015 = vmatmul.mubr.msk.bf16.vlgmr.msra.gmra.mrb[0].mxu0 %vm95_vm0, %v491_v52 }
 0x42d   :  { %v502_v12 = vpack.c.bf16 %v495_v10, %v494_v9  ;;  %v497_v15 = vld [vmem:[#allocation5 + $0x18] sm:$0xff]  ;;  %v498_v51 = vld [vmem:[#allocation5 + $0x20] sm:$0xff]  ;;  %v499_v53 = vld [vmem:[#allocation5 + $0x28] sm:$0xff]  ;;  %1018 = vmatprep.mubr.msk.bf16.mxu0 %vm95_vm0, %v492_v57 }
 0x42e   :  { %v503_v48 = vpack.c.bf16 %v497_v15, %v496_v14  ;;  %v504_v56 = vpack.c.bf16 %v499_v53, %v498_v51  ;;  %v500_v58 = vld [vmem:[#allocation5 + $0x30] sm:$0xff]  ;;  %v501_v59 = vld [vmem:[#allocation5 + $0x38] sm:$0xff] }
 0x42f   :  { %1002 = vmatprep.mubr.msk.bf16.mxu1 %vm95_vm0, %v502_v12  ;;  %v505_v62 = vpack.c.bf16 %v501_v59, %v500_v58  ;;  %v927_v59 = vld [vmem:[#allocation6] ss:$0 sm:$0xff] }
 0x430   :  { %1003 = vmatmul.mubr.msk.bf16.vlgmr.msra.gmra.mrb[0].mxu1 %vm95_vm0, %v503_v48 }
 0x431   :  { %1006 = vmatprep.mubr.msk.bf16.mxu1 %vm95_vm0, %v504_v56 }
 0x434   :  { %1019 = vmatmul.mubr.msk.bf16.gmra.mrb[4].mxu0 %vm95_vm0, %v493_v63 }
 0x438   :  { %1007 = vmatmul.mubr.msk.bf16.gmra.mrb[4].mxu1 %vm95_vm0, %v505_v62 }
 0x4ff   :  { %v1016_v2 = vpop.f32.mrb[0].mxu0 }
 0x500   :  { %v661_v6 = vpop.f32.mrb[1].mxu0 }
 0x501   :  { %v1017_v17 = vpop.f32.mrb[2].mxu0 }
 0x502   :  { %v664_v21 = vpop.f32.mrb[3].mxu0 }
 0x503   :  { %v1004_v1 = vpop.f32.mrb[0].mxu1 }
 0x504   :  { %v572_v4 = vpop.f32.mrb[1].mxu1  ;;  %v670_v5 = vadd.f32 %v1016_v2, %v1004_v1 }
 0x505   :  { %v1005_v7 = vpop.f32.mrb[2].mxu1  ;;  %v662_v8 = vadd.f32 %v661_v6, %v572_v4 }
 0x506   :  { %v575_v18 = vpop.f32.mrb[3].mxu1  ;;  %v701_v19 = vadd.f32 %v925_v3, %v670_v5  ;;  %v673_v20 = vadd.f32 %v1017_v17, %v1005_v7 }
 0x507   :  { %v699_v22 = vadd.f32 %v925_v3, %v662_v8  ;;  %v665_v23 = vadd.f32 %v664_v21, %v575_v18  ;;  %v1020_v33 = vpop.f32.mrb[4].mxu0 }
 0x508   :  { %v709_v25 = vmax.f32 %v701_v19, 0.0  ;;  %v702_v26 = vadd.f32 %v925_v3, %v673_v20  ;;  %v677_v37 = vpop.f32.mrb[5].mxu0  ;;  %v805_v20 = vlaneseq }
 0x509   :  { %v707_v27 = vmax.f32 %v699_v22, 0.0  ;;  %v700_v28 = vadd.f32 %v925_v3, %v665_v23  ;;  %v1021_v42 = vpop.f32.mrb[6].mxu0 }
 0x50a   :  { %v710_v29 = vmax.f32 %v702_v26, 0.0  ;;  %v724_v31 = vmul.f32 %v926_v24, %v709_v25  ;;  %v680_v9 = vpop.f32.mrb[7].mxu0  ;;  %v806_v22 = vand.u32 127, %v805_v20  ;;  %v808_v23 = vshrl.u32 %v805_v20, 7 }
 0x50b   :  { %v1008_v30 = vpop.f32.mrb[4].mxu1  ;;  %v708_v32 = vmax.f32 %v700_v28, 0.0  ;;  %v722_v35 = vmul.f32 %v926_v24, %v707_v27 }
 0x50c   :  { %v588_v34 = vpop.f32.mrb[5].mxu1  ;;  %v686_v36 = vadd.f32 %v1020_v33, %v1008_v30  ;;  %v737_v39 = vsel %vm730_vm2, %v724_v31, 0.0  ;;  %v725_v40 = vmul.f32 %v926_v24, %v710_v29  ;;  %v809_v26 = vsub.s32 %v806_v22, %v808_v23 }
 0x50d   :  { %v1009_v38 = vpop.f32.mrb[6].mxu1  ;;  %v678_v41 = vadd.f32 %v677_v37, %v588_v34  ;;  %738 = vadd.xlane.f32.xlu1 %v737_v39  ;;  %v731_v44 = vsel %vm730_vm2, %v722_v35, 0.0  ;;  %v723_v45 = vmul.f32 %v926_v24, %v708_v32 }
 0x50e   :  { %v591_v43 = vpop.f32.mrb[7].mxu1  ;;  %v705_v46 = vadd.f32 %v925_v3, %v686_v36  ;;  %v689_v47 = vadd.f32 %v1021_v42, %v1009_v38  ;;  %732 = vadd.xlane.f32.xlu0 %v731_v44  ;;  %v740_v14 = vsel %vm730_vm2, %v725_v40, 0.0 }
 0x50f   :  { %v703_v10 = vadd.f32 %v925_v3, %v678_v41  ;;  %v681_v11 = vadd.f32 %v680_v9, %v591_v43  ;;  %v734_v48 = vsel %vm730_vm2, %v723_v45, 0.0 }
 0x510   :  { %v713_v12 = vmax.f32 %v705_v46, 0.0  ;;  %v706_v13 = vadd.f32 %v925_v3, %v689_v47 }
 0x511   :  { %v711_v15 = vmax.f32 %v703_v10, 0.0  ;;  %v704_v16 = vadd.f32 %v925_v3, %v681_v11  ;;  %741 = vadd.xlane.f32.xlu1 %v740_v14 }
 0x512   :  { %735 = vadd.xlane.f32.xlu0 %v734_v48  ;;  %v728_v49 = vmul.f32 %v926_v24, %v713_v12  ;;  %v714_v50 = vmax.f32 %v706_v13, 0.0 }
 0x513   :  { %v712_v51 = vmax.f32 %v704_v16, 0.0  ;;  %v726_v54 = vmul.f32 %v926_v24, %v711_v15 }
 0x514   :  { %v749_v52 = vsel %vm730_vm2, %v728_v49, 0.0  ;;  %v729_v56 = vmul.f32 %v926_v24, %v714_v50 }
 0x515   :  { %v727_v53 = vmul.f32 %v926_v24, %v712_v51  ;;  %v743_v57 = vsel %vm730_vm2, %v726_v54, 0.0 }
 0x516   :  { %750 = vadd.xlane.f32.xlu0 %v749_v52  ;;  %v752_v58 = vsel %vm730_vm2, %v729_v56, 0.0 }
 0x517   :  { %v746_v55 = vsel %vm730_vm2, %v727_v53, 0.0 }
 0x518   :  { %747 = vadd.xlane.f32.xlu1 %v746_v55 }
 0x51a   :  { %744 = vadd.xlane.f32.xlu0 %v743_v57 }
 0x51c   :  { %753 = vadd.xlane.f32.xlu1 %v752_v58 }
 0x530   :  { %762 = vperm.xlu0 %1099, %v927_v59  }
 0x59a   :  { %v739_v62 = vpop.xlane.xlu1 %738 }
 0x59b   :  { %v733_v60 = vpop.xlane.xlu0 %732 }
 0x59e   :  { %v742_v0 = vpop.xlane.xlu1 %741 }
 0x59f   :  { %v736_v61 = vpop.xlane.xlu0 %735 }
 0x5a3   :  { %v751_v63 = vpop.xlane.xlu0 %750 }
 0x5a5   :  { %v748_v2 = vpop.xlane.xlu1 %747 }
 0x5a7   :  { %v745_v1 = vpop.xlane.xlu0 %744 }
 0x5a9   :  { %v754_v18 = vpop.xlane.xlu1 %753 }
 0x5af   :  { %v763_v3 = vpop.permute.xlu0 %762 }
 0x5b0   :  { %v765_v4 = vadd.f32 %v763_v3, %v733_v60  ;;  %v766_v5 = vadd.f32 %v763_v3, %v736_v61  ;;  %v767_v6 = vadd.f32 %v763_v3, %v739_v62  ;;  %v768_v7 = vadd.f32 %v763_v3, %v742_v0 }
 0x5b1   :  { %v769_v8 = vadd.f32 %v763_v3, %v745_v1  ;;  %v770_v17 = vadd.f32 %v763_v3, %v748_v2  ;;  %v771_v19 = vadd.f32 %v763_v3, %v751_v63  ;;  %v772_v21 = vadd.f32 %v763_v3, %v754_v18 }
 0x5b2   :  { %1104 = vtanh.f32 %v765_v4 }
 0x5b3   :  { %1106 = vtanh.f32 %v766_v5 }
 0x5b4   :  { %1108 = vtanh.f32 %v767_v6 }
 0x5b5   :  { %1110 = vtanh.f32 %v768_v7 }
 0x5b6   :  { %1112 = vtanh.f32 %v769_v8 }
 0x5b7   :  { %1114 = vtanh.f32 %v770_v17 }
 0x5b8   :  { %1116 = vtanh.f32 %v771_v19 }
 0x5b9   :  { %1118 = vtanh.f32 %v772_v21 }
 0x5bc   :  { %v1105_v24 = vpop.eup %1104 }
 0x5bd   :  { %v1107_v25 = vpop.eup %1106  ;;  %v781_v27 = vmul.f32 2.0, %v1105_v24 }
 0x5be   :  { %v1109_v28 = vpop.eup %1108  ;;  %v782_v29 = vmul.f32 2.0, %v1107_v25 }
 0x5bf   :  { %v1111_v30 = vpop.eup %1110  ;;  %v783_v31 = vmul.f32 2.0, %v1109_v28  ;;  %v789_v32 = vadd.f32 3.0, %v781_v27 }
 0x5c0   :  { %v1113_v33 = vpop.eup %1112  ;;  %v784_v34 = vmul.f32 2.0, %v1111_v30  ;;  %v790_v35 = vadd.f32 3.0, %v782_v29 }
 0x5c1   :  { %v1115_v36 = vpop.eup %1114  ;;  %v785_v37 = vmul.f32 2.0, %v1113_v33  ;;  %v791_v38 = vadd.f32 3.0, %v783_v31  ;;  %v810_v39 = vrot.slane %v789_v32, %v809_v26 }
 0x5c2   :  { %v1117_v40 = vpop.eup %1116  ;;  %v786_v41 = vmul.f32 2.0, %v1115_v36  ;;  %v792_v42 = vadd.f32 3.0, %v784_v34  ;;  %v814_v43 = vrot.slane %v790_v35, %v809_v26 }
 0x5c3   :  { %v1119_v44 = vpop.eup %1118  ;;  %v787_v45 = vmul.f32 2.0, %v1117_v40  ;;  %v793_v46 = vadd.f32 3.0, %v785_v37  ;;  %v818_v47 = vrot.slane %v791_v38, %v809_v26 }
 0x5c4   :  { %v788_v9 = vmul.f32 2.0, %v1119_v44  ;;  %v794_v10 = vadd.f32 3.0, %v786_v41  ;;  %v822_v11 = vrot.slane %v792_v42, %v809_v26  ;;  %v840_v12 = vsel %vm839_vm3, %v814_v43, %v810_v39 }
 0x5c5   :  { %v795_v13 = vadd.f32 3.0, %v787_v45  ;;  %v826_v14 = vrot.slane %v793_v46, %v809_v26  ;;  %v842_v15 = vsel %vm841_vm4, %v818_v47, %v840_v12 }
 0x5c6   :  { %v796_v16 = vadd.f32 3.0, %v788_v9  ;;  %v830_v48 = vrot.slane %v794_v10, %v809_v26  ;;  %v844_v49 = vsel %vm843_vm5, %v822_v11, %v842_v15 }
 0x5c7   :  { %v834_v50 = vrot.slane %v795_v13, %v809_v26  ;;  %v846_v51 = vsel %vm845_vm6, %v826_v14, %v844_v49 }
 0x5c8   :  { %v838_v52 = vrot.slane %v796_v16, %v809_v26  ;;  %v848_v53 = vsel %vm847_vm7, %v830_v48, %v846_v51 }
 0x5c9   :  { %v850_v54 = vsel %vm849_vm8, %v834_v50, %v848_v53 }
 0x5ca   :  { %v852_v55 = vsel %vm851_vm9, %v838_v52, %v850_v54 }
 0x5cb   :  { %855 = vst.msk [vmem:[%s1424_s12] sm:$0xff] %vm854_vm10, %v852_v55 }

</bundles_post_ra>
